<compile_context>
chip_gen: v7x
topology: tpu7x:2x2x1
jax: 0.10.0
libtpu: 0.0.40
codegen_flags: <defaults>
</compile_context>

<pallas_src>
import functools

import jax
import jax.numpy as jnp
from jax import lax
from jax.experimental import pallas as pl
from jax.experimental.pallas import tpu as pltpu

_NEG_BIG = -1e30  # finite "-inf": avoids inf-inf NaNs in masked LSE math


def _round_up(a: int, b: int) -> int:
    return (a + b - 1) // b * b


def _vsepp_clip_kernel(params_ref, xb_ref, yn_ref, dsim_col_ref, dcos_col_ref,
                       dsim_row_ref, rowmask_ref, colmask_ref,
                       row_hinge_ref, row_ce_ref, col_im_ref, col_m_ref,
                       col_s_ref, *, measure: str, max_violation: bool,
                       d_tile: int):
    # params_ref (SMEM f32[2]) = [margin, exp(logit_scale)]
    i = pl.program_id(0)
    tb = xb_ref.shape[0]          # rows in this x block
    n_pad = yn_ref.shape[0]       # padded batch size
    d_pad = yn_ref.shape[1]       # padded embedding dim (multiple of 128)

    margin = params_ref[0]
    scale = params_ref[1]

    rowmask = rowmask_ref[...]    # (tb, 1)   1.0 = real row, 0.0 = padding
    colmask = colmask_ref[...]    # (1, n_pad)
    dsim_col = dsim_col_ref[...]  # (tb, 1)   diag of `scores` (per-row view)
    dcos_col = dcos_col_ref[...]  # (tb, 1)   diag of cosine   (per-row view)
    dsim_row = dsim_row_ref[...]  # (1, n_pad) diag of `scores` (per-col view)

    row0 = i * tb
    rid = row0 + lax.broadcasted_iota(jnp.int32, (tb, 1), 0)
    cid = lax.broadcasted_iota(jnp.int32, (1, n_pad), 1)
    valid = (rowmask > 0.5) & (colmask > 0.5)               # (tb, n_pad)

    # Cosine block on the MXU: bf16 inputs (cast once in the wrapper),
    # f32 accumulation, contraction over D (no transpose / XLU work).
    cos = lax.dot_general(
        xb_ref[...], yn_ref[...],
        dimension_numbers=(((1,), (1,)), ((), ())),
        preferred_element_type=jnp.float32)                 # (tb, n_pad) f32

    # ------- CLIP symmetric cross-entropy partials (always cosine) ----------
    logits = jnp.where(valid, scale * cos, _NEG_BIG)
    m_r = jnp.max(logits, axis=1, keepdims=True)
    lse_r = m_r + jnp.log(jnp.sum(jnp.exp(logits - m_r), axis=1, keepdims=True))
    row_ce_ref[...] = jnp.where(rowmask > 0.5, lse_r - scale * dcos_col, 0.0)
    # Per-block column max / sum-exp, merged into a column LSE in the JAX
    # epilogue.  NOTE: fully-padded columns carry m = _NEG_BIG and a garbage
    # sum -- they are sliced away (lse_c[:n]) in the epilogue; keep it so.
    m_c = jnp.max(logits, axis=0, keepdims=True)
    col_m_ref[0] = m_c
    col_s_ref[0] = jnp.sum(jnp.exp(logits - m_c), axis=0, keepdims=True)

    # ---------------------- VSE++ margin-rank partials ----------------------
    if measure == "cosine":
        kill = (rid == cid) | jnp.logical_not(valid)
        cost_s = jnp.where(kill, 0.0, jnp.maximum(margin + cos - dsim_col, 0.0))
        cost_im = jnp.where(kill, 0.0, jnp.maximum(margin + cos - dsim_row, 0.0))
        if max_violation:
            row_hinge_ref[...] = jnp.max(cost_s, axis=1, keepdims=True)
            col_im_ref[0] = jnp.max(cost_im, axis=0, keepdims=True)
        else:
            # Sublane-only reductions per step; the single lane reduction
            # happens once in the epilogue (keeps XLU off the hot loop).
            row_hinge_ref[...] = jnp.zeros((tb, 1), jnp.float32)
            col_im_ref[0] = jnp.sum(cost_s + cost_im, axis=0, keepdims=True)
    else:
        # order_sim: scores[i, j] = -|| relu(y_j - x_i) ||_2, built in 16-row
        # sub-chunks with D tiled so the transient (16, n_pad, d_tile) buffer
        # stays bounded; hinge stats are fused per sub-chunk.
        # TODO(synk): very large N additionally needs a column-block grid axis
        #             so the transient is column-tiled as well.
        col_im_ref[0] = jnp.zeros((1, n_pad), jnp.float32)
        sub = 16                      # aligned with bf16 sublane packing
        nd = d_pad // d_tile

        def _sub_body(c, carry):
            r0 = pl.multiple_of(c * sub, sub)
            xc = xb_ref[pl.ds(r0, sub), :]                   # (sub, d_pad) bf16
            acc = jnp.zeros((sub, n_pad), jnp.float32)
            for t in range(nd):                              # static D tiling
                t0 = t * d_tile
                yt = yn_ref[:, t0:t0 + d_tile].astype(jnp.float32)
                xt = xc[:, t0:t0 + d_tile].astype(jnp.float32)
                dpos = jnp.maximum(yt[None, :, :] - xt[:, None, :], 0.0)
                acc = acc + jnp.sum(dpos * dpos, axis=2)
            sc = -jnp.sqrt(acc)                              # (sub, n_pad)

            rm = rowmask_ref[pl.ds(r0, sub), :]
            dcol = dsim_col_ref[pl.ds(r0, sub), :]
            rid_s = row0 + r0 + lax.broadcasted_iota(jnp.int32, (sub, 1), 0)
            kill_s = (rid_s == cid) | jnp.logical_not(
                (rm > 0.5) & (colmask > 0.5))
            cs = jnp.where(kill_s, 0.0, jnp.maximum(margin + sc - dcol, 0.0))
            ci = jnp.where(kill_s, 0.0, jnp.maximum(margin + sc - dsim_row, 0.0))
            if max_violation:
                row_hinge_ref[pl.ds(r0, sub), :] = jnp.max(
                    cs, axis=1, keepdims=True)
                col_im_ref[0] = jnp.maximum(
                    col_im_ref[0], jnp.max(ci, axis=0, keepdims=True))
            else:
                row_hinge_ref[pl.ds(r0, sub), :] = jnp.zeros((sub, 1),
                                                             jnp.float32)
                col_im_ref[0] = col_im_ref[0] + jnp.sum(
                    cs + ci, axis=0, keepdims=True)
            return carry

        lax.fori_loop(0, tb // sub, _sub_body, 0)


def _vmem_limit_bytes() -> int:
    """Generation-aware VMEM budget (~85% of physical, conservative fallback)."""
    try:
        cap = int(pltpu.get_tpu_info().vmem_capacity_bytes)
        return max(32 * 1024 * 1024, min(int(cap * 0.85), 112 * 1024 * 1024))
    except Exception:
        return 48 * 1024 * 1024


def _pick_block_rows(n: int, d_pad: int, block_rows, vmem_limit: int) -> int:
    n16 = _round_up(max(n, 1), 16)
    if block_rows is not None:
        return max(16, min(_round_up(block_rows, 16), n16))
    # Prefer 256-row blocks (fills the 256-wide MXU on v6e/v7x); back off when
    # the estimated working set would not fit the VMEM budget (v7x: 64 MiB).
    for cand in (256, 128, 64, 32, 16):
        tb = min(cand, n16)
        n_pad = _round_up(n, tb)
        resident = 2 * n_pad * d_pad * 2          # y table (bf16, 2 buffers)
        per_step = 2 * tb * d_pad * 2 + 8 * tb * n_pad * 4 + 8 * n_pad * 4
        if resident + per_step <= 0.7 * vmem_limit:
            return tb
    return 16


def vsepp_contrastive_loss(x, y, *, margin: float, logit_scale,
                           measure: str = "cosine", max_violation: bool = True,
                           block_rows=None):
    """Returns {"loss": vsepp, "metrics": {"clip": clip}} (mirrors LossOutput)."""
    assert x.ndim == 2 and y.ndim == 2 and x.shape == y.shape
    assert measure in ("cosine", "order")
    n, d = x.shape

    # O(N*D) prep in plain JAX (normalization matches torch F.normalize eps).
    eps = 1e-12
    xf = x.astype(jnp.float32)
    yf = y.astype(jnp.float32)
    xn = xf / jnp.maximum(jnp.sqrt(jnp.sum(xf * xf, axis=1, keepdims=True)), eps)
    yn = yf / jnp.maximum(jnp.sqrt(jnp.sum(yf * yf, axis=1, keepdims=True)), eps)

    diag_cos = jnp.sum(xn * yn, axis=1)                      # (N,), exact f32
    if measure == "order":
        diag_sim = -jnp.sqrt(jnp.sum(jnp.maximum(yn - xn, 0.0) ** 2, axis=1))
    else:
        diag_sim = diag_cos

    scale = jnp.exp(jnp.asarray(logit_scale, jnp.float32))

    # Pad D to the 128-lane grain (zero columns change neither cosine nor
    # order scores) and N to the row-block grain.
    d_pad = _round_up(d, 128)
    vmem_limit = _vmem_limit_bytes()
    tb = _pick_block_rows(n, d_pad, block_rows, vmem_limit)
    assert tb % 16 == 0
    n_pad = _round_up(n, tb)
    nb = n_pad // tb
    pad_n, pad_d = n_pad - n, d_pad - d

    # bf16 once in the wrapper: halves the resident y table and removes the
    # per-grid-step cast of the whole table inside the kernel.
    xn_b = jnp.pad(xn, ((0, pad_n), (0, pad_d))).astype(jnp.bfloat16)
    yn_b = jnp.pad(yn, ((0, pad_n), (0, pad_d))).astype(jnp.bfloat16)

    dsim_col = jnp.pad(diag_sim, (0, pad_n)).reshape(n_pad, 1)
    dcos_col = jnp.pad(diag_cos, (0, pad_n)).reshape(n_pad, 1)
    dsim_row = jnp.pad(diag_sim, (0, pad_n)).reshape(1, n_pad)
    rowmask = (jnp.arange(n_pad) < n).astype(jnp.float32).reshape(n_pad, 1)
    colmask = rowmask.reshape(1, n_pad)

    params = jnp.stack([jnp.asarray(margin, jnp.float32), scale])

    kernel = functools.partial(_vsepp_clip_kernel, measure=measure,
                               max_violation=max_violation, d_tile=128)

    smem = pltpu.MemorySpace.SMEM
    row_hinge, row_ce, col_im, col_m, col_s = pl.pallas_call(
        kernel,
        grid=(nb,),
        out_shape=(
            jax.ShapeDtypeStruct((n_pad, 1), jnp.float32),      # per-row hinge
            jax.ShapeDtypeStruct((n_pad, 1), jnp.float32),      # per-row CE
            jax.ShapeDtypeStruct((nb, 1, n_pad), jnp.float32),  # col hinge part
            jax.ShapeDtypeStruct((nb, 1, n_pad), jnp.float32),  # col LSE max
            jax.ShapeDtypeStruct((nb, 1, n_pad), jnp.float32),  # col LSE sumexp
        ),
        in_specs=[
            pl.BlockSpec(memory_space=smem),                    # params
            pl.BlockSpec((tb, d_pad), lambda i: (i, 0)),        # x row blocks
            pl.BlockSpec((n_pad, d_pad), lambda i: (0, 0)),     # y (resident)
            pl.BlockSpec((tb, 1), lambda i: (i, 0)),            # diag_sim rows
            pl.BlockSpec((tb, 1), lambda i: (i, 0)),            # diag_cos rows
            pl.BlockSpec((1, n_pad), lambda i: (0, 0)),         # diag_sim cols
            pl.BlockSpec((tb, 1), lambda i: (i, 0)),            # row validity
            pl.BlockSpec((1, n_pad), lambda i: (0, 0)),         # col validity
        ],
        out_specs=(
            pl.BlockSpec((tb, 1), lambda i: (i, 0)),
            pl.BlockSpec((tb, 1), lambda i: (i, 0)),
            pl.BlockSpec((1, 1, n_pad), lambda i: (i, 0, 0)),
            pl.BlockSpec((1, 1, n_pad), lambda i: (i, 0, 0)),
            pl.BlockSpec((1, 1, n_pad), lambda i: (i, 0, 0)),
        ),
        compiler_params=pltpu.CompilerParams(
            dimension_semantics=("parallel",),  # row blocks are independent
            vmem_limit_bytes=vmem_limit),
    )(params, xn_b, yn_b, dsim_col, dcos_col, dsim_row, rowmask, colmask)

    # -------- tiny O(nb * N) epilogue in plain JAX: merge the partials ------
    col_im = col_im[:, 0, :]
    col_m = col_m[:, 0, :]
    col_s = col_s[:, 0, :]

    if max_violation:
        vsepp = jnp.sum(row_hinge) + jnp.sum(jnp.max(col_im, axis=0))
    else:
        vsepp = jnp.sum(col_im)             # row_hinge is all zeros here

    m = jnp.max(col_m, axis=0)                                  # (n_pad,)
    s = jnp.sum(col_s * jnp.exp(col_m - m[None, :]), axis=0)
    lse_c = m + jnp.log(s)
    ce_rows = jnp.sum(row_ce) / n
    ce_cols = jnp.sum(lse_c[:n] - scale * diag_cos) / n
    clip = 0.5 * (ce_rows + ce_cols)

    return {"loss": vsepp, "metrics": {"clip": clip}}


# ---------------- pure-JAX reference (for correctness check) ----------------
def _reference(x, y, *, margin, logit_scale, measure="cosine",
               max_violation=True):
    eps = 1e-12
    xn = x / jnp.maximum(jnp.linalg.norm(x, axis=1, keepdims=True), eps)
    yn = y / jnp.maximum(jnp.linalg.norm(y, axis=1, keepdims=True), eps)
    if measure == "order":
        ymx = yn[:, None, :] - xn[None, :, :]
        scores = -jnp.sqrt(jnp.sum(jnp.maximum(ymx, 0.0) ** 2, axis=2)).T
    else:
        scores = xn @ yn.T
    n = scores.shape[0]
    diag = jnp.diag(scores)
    cost_s = jnp.maximum(margin + scores - diag[:, None], 0.0)
    cost_im = jnp.maximum(margin + scores - diag[None, :], 0.0)
    eye = jnp.eye(n, dtype=bool)
    cost_s = jnp.where(eye, 0.0, cost_s)
    cost_im = jnp.where(eye, 0.0, cost_im)
    if max_violation:
        vsepp = jnp.sum(jnp.max(cost_s, axis=1)) + jnp.sum(jnp.max(cost_im, axis=0))
    else:
        vsepp = jnp.sum(cost_s) + jnp.sum(cost_im)
    logits = jnp.exp(logit_scale) * (xn @ yn.T)
    labels = jnp.arange(n)
    lse_r = jax.nn.logsumexp(logits, axis=1)
    lse_c = jax.nn.logsumexp(logits, axis=0)
    dlog = logits[labels, labels]
    ce_r = jnp.mean(lse_r - dlog)
    ce_c = jnp.mean(lse_c - dlog)
    return vsepp, 0.5 * (ce_r + ce_c)


if __name__ == "__main__":
    # Deterministic "module params" (synthetic; no checkpoint load)
    margin = 0.2
    logit_scale = float(jnp.log(1.0 / 0.07))   # standard CLIP init

    key = jax.random.PRNGKey(0)
    kx, ky = jax.random.split(key)
    # N deliberately not a multiple of the row block -> exercises padding and
    # multi-block partial merging (2 grid steps with block_rows=16); D=32
    # exercises the lane-dim padding to 128.
    N, D = 20, 32
    x = jax.random.normal(kx, (N, D), dtype=jnp.float32)
    y = jax.random.normal(ky, (N, D), dtype=jnp.float32)

    for measure in ("cosine", "order"):
        for max_violation in (True, False):
            out = vsepp_contrastive_loss(
                x, y, margin=margin, logit_scale=logit_scale,
                measure=measure, max_violation=max_violation, block_rows=16)
            jax.block_until_ready(out)

            ref_vsepp, ref_clip = _reference(
                x, y, margin=margin, logit_scale=logit_scale,
                measure=measure, max_violation=max_violation)

            # tolerance loosened because the kernel feeds bf16 to the MXU
            assert jnp.allclose(out["loss"], ref_vsepp, atol=5e-2, rtol=5e-2), (
                measure, max_violation, out["loss"], ref_vsepp)
            assert jnp.allclose(out["metrics"]["clip"], ref_clip,
                                atol=5e-2, rtol=5e-2), (
                measure, max_violation, out["metrics"]["clip"], ref_clip)

    print("KERNEL_OK")
</pallas_src>

<mosaic_0001>
module attributes {stable_mosaic.version = 11 : i64} {
  func.func @_vsepp_clip_kernel(%arg0: i32, %arg1: memref<2xf32, #tpu.memory_space<smem>>, %arg2: memref<16x128xbf16, #tpu.memory_space<vmem>>, %arg3: memref<32x128xbf16, #tpu.memory_space<vmem>>, %arg4: memref<16x1xf32, #tpu.memory_space<vmem>>, %arg5: memref<16x1xf32, #tpu.memory_space<vmem>>, %arg6: memref<1x32xf32, #tpu.memory_space<vmem>>, %arg7: memref<16x1xf32, #tpu.memory_space<vmem>>, %arg8: memref<1x32xf32, #tpu.memory_space<vmem>>, %arg9: memref<16x1xf32, #tpu.memory_space<vmem>>, %arg10: memref<16x1xf32, #tpu.memory_space<vmem>>, %arg11: memref<1x1x32xf32, #tpu.memory_space<vmem>>, %arg12: memref<1x1x32xf32, #tpu.memory_space<vmem>>, %arg13: memref<1x1x32xf32, #tpu.memory_space<vmem>>) attributes {dimension_semantics = [#tpu.dimension_semantics<parallel>], iteration_bounds = array<i64: 2>, scalar_prefetch = 0 : i64, scratch_operands = 0 : i64, tpu.core_type = #tpu.core_type<tc>, window_params = [{transform_indices = @transform_0, window_bounds = array<i64: 2>}, {transform_indices = @transform_1, window_bounds = array<i64: 16, 128>}, {pipeline_mode = #tpu.pipeline_mode<synchronous>, transform_indices = @transform_2, window_bounds = array<i64: 32, 128>}, {transform_indices = @transform_3, window_bounds = array<i64: 16, 1>}, {transform_indices = @transform_4, window_bounds = array<i64: 16, 1>}, {pipeline_mode = #tpu.pipeline_mode<synchronous>, transform_indices = @transform_5, window_bounds = array<i64: 1, 32>}, {transform_indices = @transform_6, window_bounds = array<i64: 16, 1>}, {pipeline_mode = #tpu.pipeline_mode<synchronous>, transform_indices = @transform_7, window_bounds = array<i64: 1, 32>}, {transform_indices = @transform_8, window_bounds = array<i64: 16, 1>}, {transform_indices = @transform_9, window_bounds = array<i64: 16, 1>}, {transform_indices = @transform_10, window_bounds = array<i64: 1, 1, 32>}, {transform_indices = @transform_11, window_bounds = array<i64: 1, 1, 32>}, {transform_indices = @transform_12, window_bounds = array<i64: 1, 1, 32>}]} {
    %c0 = arith.constant 0 : index
    %0 = memref.load %arg1[%c0] : memref<2xf32, #tpu.memory_space<smem>>
    %c1 = arith.constant 1 : index
    %1 = memref.load %arg1[%c1] : memref<2xf32, #tpu.memory_space<smem>>
    %c0_0 = arith.constant 0 : index
    %c0_1 = arith.constant 0 : index
    %2 = vector.load %arg7[%c0_0, %c0_1] : memref<16x1xf32, #tpu.memory_space<vmem>>, vector<16x1xf32>
    %c0_2 = arith.constant 0 : index
    %c0_3 = arith.constant 0 : index
    %3 = vector.load %arg8[%c0_2, %c0_3] : memref<1x32xf32, #tpu.memory_space<vmem>>, vector<1x32xf32>
    %c0_4 = arith.constant 0 : index
    %c0_5 = arith.constant 0 : index
    %4 = vector.load %arg4[%c0_4, %c0_5] : memref<16x1xf32, #tpu.memory_space<vmem>>, vector<16x1xf32>
    %c0_6 = arith.constant 0 : index
    %c0_7 = arith.constant 0 : index
    %5 = vector.load %arg5[%c0_6, %c0_7] : memref<16x1xf32, #tpu.memory_space<vmem>>, vector<16x1xf32>
    %c0_8 = arith.constant 0 : index
    %c0_9 = arith.constant 0 : index
    %6 = vector.load %arg6[%c0_8, %c0_9] : memref<1x32xf32, #tpu.memory_space<vmem>>, vector<1x32xf32>
    %c16_i32 = arith.constant 16 : i32
    %7 = arith.muli %arg0, %c16_i32 : i32
    %8 = tpu.iota {dimensions = array<i32: 0>} : vector<16x1xi32>
    %9 = vector.broadcast %7 : i32 to vector<16x1xi32>
    %10 = arith.addi %9, %8 : vector<16x1xi32>
    %11 = tpu.iota {dimensions = array<i32: 1>} : vector<1x32xi32>
    %cst = arith.constant 5.000000e-01 : f32
    %12 = vector.broadcast %cst : f32 to vector<16x1xf32>
    %13 = arith.cmpf ogt, %2, %12 : vector<16x1xf32>
    %cst_10 = arith.constant 5.000000e-01 : f32
    %14 = vector.broadcast %cst_10 : f32 to vector<1x32xf32>
    %15 = arith.cmpf ogt, %3, %14 : vector<1x32xf32>
    %16 = vector.broadcast %13 : vector<16x1xi1> to vector<16x32xi1>
    %17 = vector.broadcast %15 : vector<1x32xi1> to vector<16x32xi1>
    %18 = arith.andi %16, %17 : vector<16x32xi1>
    %c0_11 = arith.constant 0 : index
    %c0_12 = arith.constant 0 : index
    %19 = vector.load %arg2[%c0_11, %c0_12] : memref<16x128xbf16, #tpu.memory_space<vmem>>, vector<16x128xbf16>
    %c0_13 = arith.constant 0 : index
    %c0_14 = arith.constant 0 : index
    %20 = vector.load %arg3[%c0_13, %c0_14] : memref<32x128xbf16, #tpu.memory_space<vmem>>, vector<32x128xbf16>
    %cst_15 = arith.constant dense<0.000000e+00> : vector<16x32xf32>
    %21 = tpu.matmul %19, %20, %cst_15 {dimension_numbers = #tpu.dot_dimension_numbers<[1], [1], [0], [0], [0, 0, 1, 0], [], []>} : vector<16x128xbf16>, vector<32x128xbf16>, vector<16x32xf32> -> vector<16x32xf32>
    %22 = vector.broadcast %1 : f32 to vector<16x32xf32>
    %23 = arith.mulf %22, %21 : vector<16x32xf32>
    %cst_16 = arith.constant -1.000000e+30 : f32
    %24 = vector.broadcast %cst_16 : f32 to vector<16x32xf32>
    %25 = arith.select %18, %23, %24 : vector<16x32xi1>, vector<16x32xf32>
    %cst_17 = arith.constant dense<0xFF800000> : vector<16xf32>
    %26 = vector.multi_reduction <maximumf>, %25, %cst_17 [1] : vector<16x32xf32> to vector<16xf32>
    %27 = vector.shape_cast %26 : vector<16xf32> to vector<16x1xf32>
    %28 = vector.broadcast %27 : vector<16x1xf32> to vector<16x32xf32>
    %29 = arith.subf %25, %28 : vector<16x32xf32>
    %30 = math.exp %29 : vector<16x32xf32>
    %cst_18 = arith.constant dense<0.000000e+00> : vector<16xf32>
    %31 = vector.multi_reduction <add>, %30, %cst_18 [1] : vector<16x32xf32> to vector<16xf32>
    %32 = vector.shape_cast %31 : vector<16xf32> to vector<16x1xf32>
    %33 = math.log %32 : vector<16x1xf32>
    %34 = arith.addf %27, %33 : vector<16x1xf32>
    %cst_19 = arith.constant 5.000000e-01 : f32
    %35 = vector.broadcast %cst_19 : f32 to vector<16x1xf32>
    %36 = arith.cmpf ogt, %2, %35 : vector<16x1xf32>
    %37 = vector.broadcast %1 : f32 to vector<16x1xf32>
    %38 = arith.mulf %37, %5 : vector<16x1xf32>
    %39 = arith.subf %34, %38 : vector<16x1xf32>
    %cst_20 = arith.constant 0.000000e+00 : f32
    %40 = vector.broadcast %cst_20 : f32 to vector<16x1xf32>
    %41 = arith.select %36, %39, %40 : vector<16x1xi1>, vector<16x1xf32>
    %c0_21 = arith.constant 0 : index
    %c0_22 = arith.constant 0 : index
    %42 = vector.load %arg10[%c0_21, %c0_22] : memref<16x1xf32, #tpu.memory_space<vmem>>, vector<16x1xf32>
    tpu.vector_store %arg10[%c0_21, %c0_22], %41 {strides = array<i32>} : memref<16x1xf32, #tpu.memory_space<vmem>>, vector<16x1xf32>,
    %cst_23 = arith.constant dense<0xFF800000> : vector<32xf32>
    %43 = vector.multi_reduction <maximumf>, %25, %cst_23 [0] : vector<16x32xf32> to vector<32xf32>
    %44 = vector.shape_cast %43 : vector<32xf32> to vector<1x32xf32>
    %c0_24 = arith.constant 0 : index
    %c0_25 = arith.constant 0 : index
    %c0_26 = arith.constant 0 : index
    %45 = vector.load %arg12[%c0_24, %c0_25, %c0_26] : memref<1x1x32xf32, #tpu.memory_space<vmem>>, vector<1x1x32xf32>
    %46 = vector.shape_cast %45 : vector<1x1x32xf32> to vector<1x32xf32>
    %47 = vector.shape_cast %44 : vector<1x32xf32> to vector<1x1x32xf32>
    tpu.vector_store %arg12[%c0_24, %c0_25, %c0_26], %47 {strides = array<i32>} : memref<1x1x32xf32, #tpu.memory_space<vmem>>, vector<1x1x32xf32>,
    %48 = vector.broadcast %44 : vector<1x32xf32> to vector<16x32xf32>
    %49 = arith.subf %25, %48 : vector<16x32xf32>
    %50 = math.exp %49 : vector<16x32xf32>
    %cst_27 = arith.constant dense<0.000000e+00> : vector<32xf32>
    %51 = vector.multi_reduction <add>, %50, %cst_27 [0] : vector<16x32xf32> to vector<32xf32>
    %52 = vector.shape_cast %51 : vector<32xf32> to vector<1x32xf32>
    %c0_28 = arith.constant 0 : index
    %c0_29 = arith.constant 0 : index
    %c0_30 = arith.constant 0 : index
    %53 = vector.load %arg13[%c0_28, %c0_29, %c0_30] : memref<1x1x32xf32, #tpu.memory_space<vmem>>, vector<1x1x32xf32>
    %54 = vector.shape_cast %53 : vector<1x1x32xf32> to vector<1x32xf32>
    %55 = vector.shape_cast %52 : vector<1x32xf32> to vector<1x1x32xf32>
    tpu.vector_store %arg13[%c0_28, %c0_29, %c0_30], %55 {strides = array<i32>} : memref<1x1x32xf32, #tpu.memory_space<vmem>>, vector<1x1x32xf32>,
    %56 = vector.broadcast %10 : vector<16x1xi32> to vector<16x32xi32>
    %57 = vector.broadcast %11 : vector<1x32xi32> to vector<16x32xi32>
    %58 = arith.cmpi eq, %56, %57 : vector<16x32xi32>
    %cst_31 = arith.constant dense<true> : vector<16x32xi1>
    %59 = arith.xori %18, %cst_31 : vector<16x32xi1>
    %60 = arith.ori %58, %59 : vector<16x32xi1>
    %61 = vector.broadcast %0 : f32 to vector<16x32xf32>
    %62 = arith.addf %61, %21 : vector<16x32xf32>
    %63 = vector.broadcast %4 : vector<16x1xf32> to vector<16x32xf32>
    %64 = arith.subf %62, %63 : vector<16x32xf32>
    %cst_32 = arith.constant 0.000000e+00 : f32
    %65 = vector.broadcast %cst_32 : f32 to vector<16x32xf32>
    %66 = arith.maximumf %64, %65 : vector<16x32xf32>
    %cst_33 = arith.constant 0.000000e+00 : f32
    %67 = vector.broadcast %cst_33 : f32 to vector<16x32xf32>
    %68 = arith.select %60, %67, %66 : vector<16x32xi1>, vector<16x32xf32>
    %69 = vector.broadcast %0 : f32 to vector<16x32xf32>
    %70 = arith.addf %69, %21 : vector<16x32xf32>
    %71 = vector.broadcast %6 : vector<1x32xf32> to vector<16x32xf32>
    %72 = arith.subf %70, %71 : vector<16x32xf32>
    %cst_34 = arith.constant 0.000000e+00 : f32
    %73 = vector.broadcast %cst_34 : f32 to vector<16x32xf32>
    %74 = arith.maximumf %72, %73 : vector<16x32xf32>
    %cst_35 = arith.constant 0.000000e+00 : f32
    %75 = vector.broadcast %cst_35 : f32 to vector<16x32xf32>
    %76 = arith.select %60, %75, %74 : vector<16x32xi1>, vector<16x32xf32>
    %cst_36 = arith.constant dense<0xFF800000> : vector<16xf32>
    %77 = vector.multi_reduction <maximumf>, %68, %cst_36 [1] : vector<16x32xf32> to vector<16xf32>
    %78 = vector.shape_cast %77 : vector<16xf32> to vector<16x1xf32>
    %c0_37 = arith.constant 0 : index
    %c0_38 = arith.constant 0 : index
    %79 = vector.load %arg9[%c0_37, %c0_38] : memref<16x1xf32, #tpu.memory_space<vmem>>, vector<16x1xf32>
    tpu.vector_store %arg9[%c0_37, %c0_38], %78 {strides = array<i32>} : memref<16x1xf32, #tpu.memory_space<vmem>>, vector<16x1xf32>,
    %cst_39 = arith.constant dense<0xFF800000> : vector<32xf32>
    %80 = vector.multi_reduction <maximumf>, %76, %cst_39 [0] : vector<16x32xf32> to vector<32xf32>
    %81 = vector.shape_cast %80 : vector<32xf32> to vector<1x32xf32>
    %c0_40 = arith.constant 0 : index
    %c0_41 = arith.constant 0 : index
    %c0_42 = arith.constant 0 : index
    %82 = vector.load %arg11[%c0_40, %c0_41, %c0_42] : memref<1x1x32xf32, #tpu.memory_space<vmem>>, vector<1x1x32xf32>
    %83 = vector.shape_cast %82 : vector<1x1x32xf32> to vector<1x32xf32>
    %84 = vector.shape_cast %81 : vector<1x32xf32> to vector<1x1x32xf32>
    tpu.vector_store %arg11[%c0_40, %c0_41, %c0_42], %84 {strides = array<i32>} : memref<1x1x32xf32, #tpu.memory_space<vmem>>, vector<1x1x32xf32>,
    return
  }
  func.func @transform_0(%arg0: i32) -> i32 {
    %c0_i32 = arith.constant 0 : i32
    %c0_i32_0 = arith.constant 0 : i32
    return %c0_i32 : i32
  }
  func.func @transform_1(%arg0: i32) -> (i32, i32) {
    %c0_i32 = arith.constant 0 : i32
    %c0_i32_0 = arith.constant 0 : i32
    return %arg0, %c0_i32 : i32, i32
  }
  func.func @transform_2(%arg0: i32) -> (i32, i32) {
    %c0_i32 = arith.constant 0 : i32
    %c0_i32_0 = arith.constant 0 : i32
    %c0_i32_1 = arith.constant 0 : i32
    return %c0_i32, %c0_i32_0 : i32, i32
  }
  func.func @transform_3(%arg0: i32) -> (i32, i32) {
    %c0_i32 = arith.constant 0 : i32
    %c0_i32_0 = arith.constant 0 : i32
    return %arg0, %c0_i32 : i32, i32
  }
  func.func @transform_4(%arg0: i32) -> (i32, i32) {
    %c0_i32 = arith.constant 0 : i32
    %c0_i32_0 = arith.constant 0 : i32
    return %arg0, %c0_i32 : i32, i32
  }
  func.func @transform_5(%arg0: i32) -> (i32, i32) {
    %c0_i32 = arith.constant 0 : i32
    %c0_i32_0 = arith.constant 0 : i32
    %c0_i32_1 = arith.constant 0 : i32
    return %c0_i32, %c0_i32_0 : i32, i32
  }
  func.func @transform_6(%arg0: i32) -> (i32, i32) {
    %c0_i32 = arith.constant 0 : i32
    %c0_i32_0 = arith.constant 0 : i32
    return %arg0, %c0_i32 : i32, i32
  }
  func.func @transform_7(%arg0: i32) -> (i32, i32) {
    %c0_i32 = arith.constant 0 : i32
    %c0_i32_0 = arith.constant 0 : i32
    %c0_i32_1 = arith.constant 0 : i32
    return %c0_i32, %c0_i32_0 : i32, i32
  }
  func.func @transform_8(%arg0: i32) -> (i32, i32) {
    %c0_i32 = arith.constant 0 : i32
    %c0_i32_0 = arith.constant 0 : i32
    return %arg0, %c0_i32 : i32, i32
  }
  func.func @transform_9(%arg0: i32) -> (i32, i32) {
    %c0_i32 = arith.constant 0 : i32
    %c0_i32_0 = arith.constant 0 : i32
    return %arg0, %c0_i32 : i32, i32
  }
  func.func @transform_10(%arg0: i32) -> (i32, i32, i32) {
    %c0_i32 = arith.constant 0 : i32
    %c0_i32_0 = arith.constant 0 : i32
    %c0_i32_1 = arith.constant 0 : i32
    return %arg0, %c0_i32, %c0_i32_0 : i32, i32, i32
  }
  func.func @transform_11(%arg0: i32) -> (i32, i32, i32) {
    %c0_i32 = arith.constant 0 : i32
    %c0_i32_0 = arith.constant 0 : i32
    %c0_i32_1 = arith.constant 0 : i32
    return %arg0, %c0_i32, %c0_i32_0 : i32, i32, i32
  }
  func.func @transform_12(%arg0: i32) -> (i32, i32, i32) {
    %c0_i32 = arith.constant 0 : i32
    %c0_i32_0 = arith.constant 0 : i32
    %c0_i32_1 = arith.constant 0 : i32
    return %arg0, %c0_i32, %c0_i32_0 : i32, i32, i32
  }
}

</mosaic_0001>

<bundles_post_ra>
// kernel: tpu_custom_call.1
= control target key start
LH: loop header
LB: loop body
LE: loop exit
PB: predicated region body
PF: predicated region fallthrough
CT: control target
= control target key end

     0   :  { %s1694_s0 = inlined_call_operand.vmem [shape: f32[2], index: 0, kind: input, shape index: {}]   ;;  %s1695_s1 = inlined_call_operand.vmem [shape: bf16[32,128], index: 1, kind: input, shape index: {}]   ;;  %s1696_s2 = inlined_call_operand.vmem [shape: bf16[32,128], index: 2, kind: input, shape index: {}]   ;;  %s1697_s3 = inlined_call_operand.vmem [shape: f32[32,1], index: 3, kind: input, shape index: {}]   ;;  %s1698_s4 = inlined_call_operand.vmem [shape: f32[32,1], index: 4, kind: input, shape index: {}]   ;;  %s1699_s5 = inlined_call_operand.vmem [shape: f32[1,32], index: 5, kind: input, shape index: {}]   ;;  %s1700_s6 = inlined_call_operand.vmem [shape: f32[32,1], index: 6, kind: input, shape index: {}]   ;;  %s1701_s7 = inlined_call_operand.vmem [shape: f32[1,32], index: 7, kind: input, shape index: {}]   ;;  %s1702_s8 = inlined_call_operand.vmem [shape: f32[32,1], index: 8, kind: output, shape index: {0}]   ;;  %s1703_s9 = inlined_call_operand.vmem [shape: f32[32,1], index: 9, kind: output, shape index: {1}]   ;;  %s1704_s10 = inlined_call_operand.hbm [shape: f32[2,1,32], index: 10, kind: output, shape index: {2}]   ;;  %s1705_s11 = inlined_call_operand.hbm [shape: f32[2,1,32], index: 11, kind: output, shape index: {3}]   ;;  %s1706_s12 = inlined_call_operand.hbm [shape: f32[2,1,32], index: 12, kind: output, shape index: {4}]  }
   0x1   :  { %1710 = sst [smem:[#allocation13_spill]] %s1694_s0 }
   0x2   :  { %1711 = sst [smem:[#allocation14_spill]] %s1695_s1 }
   0x3   :  { %1712 = sst [smem:[#allocation15_spill]] %s1696_s2 }
   0x4   :  { %1713 = sst [smem:[#allocation16_spill]] %s1697_s3 }
   0x5   :  { %1714 = sst [smem:[#allocation17_spill]] %s1699_s5 }
   0x6   :  { %18 = vsyncpa [#allocation4], 0 }
   0x7   :  { %19 = vsyncpa [#allocation3], 0 }
   0x8   :  { %21 = vsyncpa [#allocation3 + $0x1], 0 }
   0x9   :  { %22 = vsyncpa [#allocation7], 0 }
   0xa   :  { %24 = vsyncpa [#allocation7 + $0x1], 0  ;;  %s1368_s21 = smov 0   ;;  %s1370_s22 = smov 0  }
   0xb   :  { %s1372_s23 = smov 0   ;;  %s1374_s24 = smov 0  }
   0xc LB: > { %s1389_s25 = sadd.s32 4294967295, %s1293_s24   ;;  %s1707_s26 = sadd.s32 4294967294, %s1293_s24   ;;  %s1293_s24 = sphi %s1374_s24, %s1741_s24   ;;  %s1289_s23 = sphi %s1372_s23, %s1740_s23   ;;  %s1285_s22 = sphi %s1370_s22, %s1739_s22   ;;  %s1281_s21 = sphi %s1368_s21, %s1738_s21  }
   0xd   : > { %s1393_s27 = sadd.s32 1, %s1293_s24   ;;  %s277_s28 = sadd.s32 1, %s1289_s23 }
   0xe   : > { %s274_s29 = ssub.s32 %s1293_s24, %s1393_s27  ;;  %p287_p0 = scmp.ne.s32.totalorder %s1289_s23, %s1285_s22 }
   0xf   : > { %p275_p1 = scmp.eq.s32.totalorder %s274_s29, 0  ;;  %p288_p2 = scmp.eq.s32.totalorder %s1389_s25, 1 }
  0x10   : > { %p293_p3 = scmp.ne.s32.totalorder %s1285_s22, %s1281_s21  ;;  %p294_p4 = scmp.eq.s32.totalorder %s1707_s26, 1 }
  0x11   : > { %s1406_s30 = scalar_select %p275_p1, %s1289_s23, %s277_s28  }
  0x12   : > { %p1408_p5 = por %p288_p2, %p287_p0  ;;  %p1412_p6 = por %p294_p4, %p293_p3 }
  0x13   : > { %1715 = sst [smem:[#allocation12_spill]] %s1406_s30  ;;  %p1032_p7 = scmp.ge.s32.totalorder %s1293_s24, 1 }
  0x14   : > { %p353_p8 = scmp.lt.s32.totalorder %s1293_s24, 3  ;;  %p1095_p9 = scmp.eq.s32.totalorder %s1389_s25, 0 }
  0x15   : > { %s1719_s0 = sld [smem:[#allocation13_spill]] }
  0x16   : > { %p1419_p10 = pnand %p1032_p7, %p353_p8 }
  0x18   : > { %p1081_p11 = pneg %p1419_p10 }
  0x1a   : > { %p1082_p12 = pnand %p1095_p9, %p1081_p11 }
  0x1b   : > { %s366_s18 = sshll.u32 %s1719_s0, 4  ;;  %s367_s18 = int_to_ptr.vmem [resolvable:$true] %s366_s18 }
  0x1c   : > { %s1152_s19 = scalar_lea.vmem %s367_s18, 16  ;;  %p1154_p0 = pneg %p1082_p12 }
  0x1d   : > { %p1153_p13 = scmp.ne.s32.totalorder %s367_s18, %s1152_s19  ;;  %p1160_p3 = scmp.lt.s32.totalorder %s367_s18, %s367_s18 }
  0x1e   : > { %p1161_p4 = scmp.lt.s32.totalorder %s1152_s19, %s1152_s19 }
  0x1f   : > { %p1155_p1 = pnand %p1154_p0, %p1153_p13 }
  0x20   : > { %p1162_p7 = por %p1161_p4, %p1160_p3 }
  0x21   : > { %p1156_p2 = pneg %p1155_p1 }
  0x23   : > { %p1163_p8 = pnand %p1162_p7, %p1156_p2 }
  0x25   : > { %1166 = shalt.err (!%p1163_p8)
}
  0x26   : > { %s1295_s20 = smov [#allocation2]   ;;  %424 = sbr.rel (%p1419_p10) target bundleno = 610 (0x262), region = 52 }
  0x27   : > { %1084 = dma.vmem_to_smem (!%p1082_p12), %s367_s18, 16, %s1295_s20, [#allocation4]  }
  0x2d   : > { %1268 = dma.done.wait (%p1095_p9), [#allocation4], 16  }
  0x2e   : > { %1270 = vsyncadd (%p1095_p9), [#allocation4], 4294967280 }
  0x2f   : > { %430 = sfence }
  0x30   : > { %s1720_s2 = sld [smem:[#allocation15_spill]]  ;;  %v1296_v1 = vmov 0.0   ;;  %vm1297_vm0 = vmmov 0   ;;  %s1037_s16 = sshll.u32 %s1389_s25, 1  ;;  %v1298_v2 = vmov 0   ;;  %v547_v10 = vlaneseq }
  0x31   : > { %1063 = vmatprep.subr.bf16.mxu0 %v1296_v1  ;;  %1067 = vmatprep.mubr.msk.bf16.mxu0 %vm1297_vm0, %v1296_v1  ;;  %p500_p10 = scmp.lt.s32.totalorder %s1037_s16, 3  ;;  %s1721_s1 = sld [smem:[#allocation14_spill]]  ;;  %v540_v11 = vld [vmem:[%s1701_s7] sm:$0x1]  ;;  %vm646_vm9 = vcmask 261120   ;;  %vm1299_vm11 = vmmov 1  }
  0x32   : > { %1135 = vset.pattern.permute.xlu0 %v1298_v2  ;;  %1136 = vset.pattern.permute.xlu1 %v1298_v2  ;;  %s1722_s3 = sld [smem:[#allocation16_spill]]  ;;  %v548_v12 = vshrl.u32 %v547_v10, 7  ;;  %vm557_vm3 = vcmp.gt.f32.partialorder %v540_v11, 0.5  ;;  %s1472_s17 = sld [smem:[#allocation2]]  ;;  %v554_v23 = vand.u32 127, %v547_v10 }
  0x33   : > { %s1743_s16 = smov (!%p500_p10, %s1037_s16), 3  ;;  %v568_v14 = vsel %vm557_vm3, 1, %v1298_v2  ;;  %s1475_s20 = sshll.u32 %s1389_s25, 4  ;;  %vm687_vm3 = vcmask 253952  }
  0x34   : > { %s1038_s18 = sshll.u32 %s1743_s16, 2  ;;  %s1443_s19 = sshll.u32 %s1743_s16, 3  ;;  %v571_v13 = vsub.s32 0, %v548_v12  ;;  %v550_v17 = vstv %s1475_s20  ;;  %v549_v19 = vadd.s32 8, %v548_v12 }
  0x35   : > { %s521_s30 = scalar_lea.vmem %s1700_s6, %s1443_s19  ;;  %v551_v22 = vadd.s32 %v550_v17, %v548_v12  ;;  %s1725_s5 = sld [smem:[#allocation17_spill]] }
  0x36   : > { %v1137_v0 = vld [vmem:[%s1720_s2] sm:$0xff]   ;;  %v1138_v3 = vld [vmem:[%s1720_s2 + $0x8] sm:$0xff]   ;;  %v572_v16 = vrot.slane %v568_v14, %v571_v13  ;;  %v552_v27 = vadd.s32 %v550_v17, %v549_v19  ;;  %s1534_s0 = sand.u32 1, %s1285_s22   ;;  %s774_s15 = sand.u32 1, %s1389_s25  }
  0x37   : > { %1064 = vmatpush3.bf16.xpose.msra.mxu0 %v1137_v0  ;;  %s503_s29 = scalar_lea.vmem %s1721_s1, %s1038_s18  ;;  %v1452_v4 = vld [vmem:[%s521_s30] sm:$0xff]  ;;  %v1454_v5 = vld [vmem:[%s521_s30 + $0x8] sm:$0xff]  ;;  %s1049_s18 = sld [smem:[#allocation2 + $0x1]]  ;;  %vm705_vm10 = vcmp.eq.s32.totalorder %v551_v22, %v554_v23 }
  0x38   : > { %1065 = vmatprep.subr.bf16.mxu0 %v1296_v1  ;;  %vm555_vm1 = vcmp.gt.f32.partialorder %v1452_v4, 0.5  ;;  %vm556_vm2 = vcmp.gt.f32.partialorder %v1454_v5, 0.5  ;;  %v1139_v7 = vld [vmem:[%s503_s29] sm:$0xff]   ;;  %s1466_s16 = scalar_lea.vmem %s1722_s3, %s1443_s19  ;;  %vm573_vm4 = vcmp.eq.s32.totalorder %v572_v16, 1  ;;  %v711_v21 = vstv %s1472_s17  ;;  %s492_s26 = scalar_lea.vmem [#allocation6], %s1534_s0 }
  0x39   : > { %v558_v6 = vsel %vm555_vm1, 1, %v1298_v2  ;;  %v559_v8 = vsel %vm556_vm2, 1, %v1298_v2  ;;  %v541_v9 = vld [vmem:[%s1466_s16] sm:$0xff]  ;;  %vm706_vm13 = vcmp.eq.s32.totalorder %v552_v27, %v554_v23  ;;  %v542_v11 = vld [vmem:[%s1466_s16 + $0x8] sm:$0xff]  ;;  %s1709_s30 = scalar_lea.vmem [#allocation5], %s1534_s0  ;;  %s1708_s16 = scalar_lea.vmem [#allocation8], %s1534_s0 }
  0x3a   : > { %561 = vperm.xlu0 %1135, %v558_v6   ;;  %s812_s17 = sshll.u32 %s492_s26, 4  ;;  %s1571_s29 = scalar_lea.hbm %s1705_s11, %s1475_s20  ;;  %s813_s17 = int_to_ptr.vmem [resolvable:$true] %s812_s17 }
  0x3b   : > { %v1054_v25 = vld [vmem:[%s1725_s5] ss:$0 sm:$0xff]  ;;  %s1300_s1 = smov [#allocation6]  }
  0x3c   : > { %s1171_s2 = sshll.u32 %s1300_s1, 4  ;;  %s1172_s2 = int_to_ptr.vmem [resolvable:$false] %s1171_s2 }
  0x3d   : > { %v1478_v20 = vstv %s1049_s18  ;;  %s1173_s3 = scalar_lea.vmem %s1172_s2, 32  ;;  %p1174_p13 = scmp.lt.s32.totalorder %s813_s17, %s1172_s2 }
  0x3e   : > { %564 = vperm.xlu0 %1135, %v559_v8  }
  0x3f   : > { %1066 = vmatpush3.bf16.xpose.msra.mxu0 %v1138_v3 }
  0x42   : > { %716 = vperm.xlu0 %1135, %v541_v9  }
  0x46   : > { %1068 = vmatmul.mubr.bf16.vlgmr.msra.gmra.mrb[0].mxu0 %v1139_v7 }
  0xb9   : > { %v562_v15 = vpop.permute.xlu0 %561 }
  0xba   : > { %vm566_vm5 = vcmp.eq.s32.totalorder %v562_v15, 1 }
  0xbb   : > { %vm1481_vm7 = vmand %vm566_vm5, %vm573_vm4 }
  0xbc   : > { %vm1495_vm12 = vmxor %vm1481_vm7, %vm1299_vm11 }
  0xbd   : > { %v565_v18 = vpop.permute.xlu0 %564  ;;  %vm1514_vm15 = vmor %vm705_vm10, %vm1495_vm12 }
  0xbe   : > { %vm567_vm6 = vcmp.eq.s32.totalorder %v565_v18, 1 }
  0xbf   : > { %vm1489_vm8 = vmand %vm567_vm6, %vm573_vm4 }
  0xc0   : > { %vm708_vm14 = vmxor %vm1489_vm8, %vm1299_vm11 }
  0xc1   : > { %v717_v32 = vpop.permute.xlu0 %716  ;;  %vm1525_vm0 = vmor %vm706_vm13, %vm708_vm14 }
 0x119   : > { %v634_v26 = vpop.f32.mrb[0].mxu0 }
 0x11a   : > { %v642_v28 = vmul.f32 %v1478_v20, %v634_v26  ;;  %v712_v29 = vadd.f32 %v711_v21, %v634_v26  ;;  %v1069_v30 = vpop.f32.mrb[1].mxu0 }
 0x11b   : > { %v637_v33 = vpop.f32.mrb[2].mxu0 }
 0x11c   : > { %v724_v35 = vsub.f32 %v712_v29, %v717_v32  ;;  %v736_v36 = vsub.f32 %v712_v29, %v1054_v25  ;;  %v643_v37 = vmul.f32 %v1478_v20, %v637_v33  ;;  %v1500_v38 = vadd.f32 %v711_v21, %v637_v33  ;;  %v1070_v39 = vpop.f32.mrb[3].mxu0 }
 0x11d   : > { %v644_v40 = vsel %vm1481_vm7, %v642_v28, -1e+30 }
 0x11e   : > { %v738_v41 = vmax.f32 %v736_v36, 0.0  ;;  %v737_v42 = vsub.f32 %v1500_v38, %v1054_v25  ;;  %v647_v43 = vsel %vm646_vm9, %v644_v40, -inf  ;;  %v645_v44 = vsel %vm1489_vm8, %v643_v37, -1e+30 }
 0x11f   : > { %648 = vmax.xlane.f32.xlu1 %v647_v43  ;;  %v650_v45 = vsel %vm646_vm9, %v645_v44, -inf  ;;  %v1518_v47 = vmax.f32 %v724_v35, 0.0 }
 0x120   : > { %v739_v48 = vmax.f32 %v737_v42, 0.0  ;;  %v680_v49 = vmax.f32 %v647_v43, %v650_v45  ;;  %v740_v50 = vsel %vm1514_vm15, 0.0, %v738_v41 }
 0x121   : > { %v728_v51 = vsel %vm1514_vm15, 0.0, %v1518_v47  ;;  %v750_v55 = vsel %vm646_vm9, %v740_v50, -inf }
 0x122   : > { %v681_v53 = vrot.slane %v680_v49, 4  ;;  %v741_v54 = vsel %vm1525_vm0, 0.0, %v739_v48  ;;  %v742_v36 = vsel %vm646_vm9, %v728_v51, -inf }
 0x123   : > { %651 = vmax.xlane.f32.xlu1 %v650_v45  ;;  %v751_v56 = vsel %vm646_vm9, %v741_v54, -inf }
 0x124   : > { %v682_v57 = vmax.f32 %v680_v49, %v681_v53  ;;  %v752_v58 = vmax.f32 %v750_v55, %v751_v56 }
 0x126   : > { %v683_v59 = vrot.slane %v682_v57, 2  ;;  %v753_v60 = vrot.slane %v752_v58, 4 }
 0x128   : > { %v684_v61 = vmax.f32 %v682_v57, %v683_v59  ;;  %v754_v62 = vmax.f32 %v752_v58, %v753_v60 }
 0x12a   : > { %v685_v63 = vrot.slane %v684_v61, 1  ;;  %v755_v0 = vrot.slane %v754_v62, 2 }
 0x12c   : > { %v686_v1 = vmax.f32 %v684_v61, %v685_v63  ;;  %v756_v2 = vmax.f32 %v754_v62, %v755_v0 }
 0x12e   : > { %v689_v3 = vsub.f32 %v644_v40, %v686_v1  ;;  %v690_v6 = vsub.f32 %v645_v44, %v686_v1  ;;  %688 = vst.msk [vmem:[%s492_s26] sm:$0x1] %vm687_vm3, %v686_v1  ;;  %v757_v7 = vrot.slane %v756_v2, 1 }
 0x130   : > { %v691_v8 = vmul.f32 1.442695, %v689_v3  ;;  %v693_v9 = vmul.f32 1.442695, %v690_v6  ;;  %v758_v10 = vmax.f32 %v756_v2, %v757_v7 }
 0x132   : > { %1140 = vpow2.f32 %v691_v8  ;;  %759 = vst.msk [vmem:[%s1709_s30] sm:$0x1] %vm687_vm3, %v758_v10  ;;  %s1167_s30 = scalar_lea.vmem %s813_s17, 16 }
 0x133   : > { %1142 = vpow2.f32 %v693_v9  ;;  %p1168_p9 = scmp.ne.s32.totalorder %s813_s17, %s1167_s30  ;;  %p1175_p0 = scmp.lt.s32.totalorder %s1173_s3, %s1167_s30 }
 0x134   : > { %721 = vperm.xlu1 %1136, %v542_v11  }
 0x135   : > { %p1169_p11 = pnand %p1168_p9, %p1408_p5  ;;  %p1176_p1 = por %p1175_p0, %p1174_p13 }
 0x137   : > { %p1170_p12 = pneg %p1169_p11 }
 0x139   : > { %p1177_p2 = pnand %p1176_p1, %p1170_p12 }
 0x13c   : > { %v1141_v12 = vpop.eup %1140 }
 0x13d   : > { %v1143_v13 = vpop.eup %1142  ;;  %v695_v14 = vsel %vm646_vm9, %v1141_v12, 0.0 }
 0x13e   : > { %v696_v15 = vsel %vm646_vm9, %v1143_v13, 0.0 }
 0x13f   : > { %v697_v16 = vadd.f32 %v696_v15, %v695_v14 }
 0x141   : > { %v698_v17 = vrot.slane %v697_v16, 4 }
 0x143   : > { %v699_v18 = vadd.f32 %v698_v17, %v697_v16 }
 0x145   : > { %v700_v19 = vrot.slane %v699_v18, 2 }
 0x147   : > { %v701_v21 = vadd.f32 %v700_v19, %v699_v18 }
 0x149   : > { %v702_v22 = vrot.slane %v701_v21, 1 }
 0x14b   : > { %v703_v23 = vadd.f32 %v702_v22, %v701_v21 }
 0x14d   : > { %704 = vst.msk [vmem:[%s1708_s16] sm:$0x1] %vm687_vm3, %v703_v23  ;;  %s1573_s16 = scalar_lea.sflag [#allocation7], %s774_s15 }
 0x1ac   : > { %v1551_v24 = vpop.xlane.xlu1 %648 }
 0x1ad   : > { %v653_v25 = vsub.f32 %v644_v40, %v1551_v24 }
 0x1af   : > { %v655_v26 = vmul.f32 1.442695, %v653_v25 }
 0x1b0   : > { %v1554_v27 = vpop.xlane.xlu1 %651 }
 0x1b1   : > { %1144 = vpow2.f32 %v655_v26  ;;  %v654_v28 = vsub.f32 %v645_v44, %v1554_v27 }
 0x1b3   : > { %v657_v29 = vmul.f32 1.442695, %v654_v28 }
 0x1b4   : > { %v722_v30 = vpop.permute.xlu1 %721 }
 0x1b5   : > { %1146 = vpow2.f32 %v657_v29  ;;  %v725_v31 = vsub.f32 %v1500_v38, %v722_v30 }
 0x1b7   : > { %v727_v34 = vmax.f32 %v725_v31, 0.0 }
 0x1b9   : > { %v729_v39 = vsel %vm1525_vm0, 0.0, %v727_v34 }
 0x1ba   : > { %v745_v40 = vsel %vm646_vm9, %v729_v39, -inf }
 0x1bb   : > { %v1145_v32 = vpop.eup %1144 }
 0x1bc   : > { %v659_v33 = vsel %vm646_vm9, %v1145_v32, 0.0 }
 0x1bd   : > { %660 = vadd.xlane.f32.xlu0 %v659_v33 }
 0x1bf   : > { %v1147_v35 = vpop.eup %1146 }
 0x1c0   : > { %v662_v37 = vsel %vm646_vm9, %v1147_v35, 0.0 }
 0x1c1   : > { %743 = vmax.xlane.f32.xlu0 %v742_v36  ;;  %663 = vadd.xlane.f32.xlu1 %v662_v37 }
 0x1c5   : > { %746 = vmax.xlane.f32.xlu0 %v745_v40 }
 0x1c6   : > { %1180 = shalt.err (!%p1177_p2)
}
 0x1c7   : > { %s1181_s25 = scalar_lea.hbm %s1571_s29, 16  ;;  %s1185_s1 = scalar_lea.hbm %s1705_s11, 32 }
 0x1c8   : > { %p1182_p3 = scmp.ne.s32.totalorder %s1571_s29, %s1181_s25  ;;  %p1186_p8 = scmp.lt.u32.totalorder %s1571_s29, %s1705_s11 }
 0x1c9   : > { %p1187_p10 = scmp.lt.u32.totalorder %s1185_s1, %s1181_s25  ;;  %p1189_p11 = scmp.lt.u32.totalorder %s1181_s25, %s1571_s29 }
 0x1ca   : > { %p1183_p4 = pnand %p1182_p3, %p1408_p5 }
 0x1cb   : > { %p1188_p9 = por %p1187_p10, %p1186_p8 }
 0x1cc   : > { %p1184_p7 = pneg %p1183_p4 }
 0x1cd   : > { %p1190_p12 = por %p1189_p11, %p1188_p9 }
 0x1cf   : > { %p1191_p13 = pnand %p1190_p12, %p1184_p7 }
 0x1d1   : > { %1194 = shalt.err (!%p1191_p13)
}
 0x1d2   : > { %1076 = dma.vmem_to_hbm [thread:$0]  (%p1408_p5), %s813_s17, 16, %s1571_s29, %s1573_s16  }
 0x1d3   : > { %s1597_s28 = scalar_lea.hbm %s1704_s10, %s1475_s20  ;;  %s1734_s26 = scalar_lea.vmem [#allocation5], %s1534_s0 }
 0x1d4   : > { %s799_s25 = sshll.u32 %s1734_s26, 4  ;;  %s1607_s18 = scalar_lea.hbm %s1706_s12, %s1475_s20  ;;  %s1601_s25 = int_to_ptr.vmem [resolvable:$true] %s799_s25 }
 0x1d5   : > { %s771_s2 = scalar_lea.sflag [#allocation3], %s1534_s0  ;;  %s1195_s5 = scalar_lea.vmem %s1601_s25, 16 }
 0x1d6   : > { %p1196_p0 = scmp.ne.s32.totalorder %s1601_s25, %s1195_s5  ;;  %s1301_s17 = smov [#allocation5]  }
 0x1d7   : > { %s1199_s29 = sshll.u32 %s1301_s17, 4  ;;  %s1200_s29 = int_to_ptr.vmem [resolvable:$false] %s1199_s29 }
 0x1d8   : > { %p1197_p1 = pnand %p1196_p0, %p1408_p5  ;;  %s1201_s3 = scalar_lea.vmem %s1200_s29, 32 }
 0x1d9   : > { %p1202_p3 = scmp.lt.s32.totalorder %s1601_s25, %s1200_s29  ;;  %p1203_p4 = scmp.lt.s32.totalorder %s1201_s3, %s1195_s5 }
 0x1da   : > { %p1198_p2 = pneg %p1197_p1 }
 0x1db   : > { %p1204_p7 = por %p1203_p4, %p1202_p3 }
 0x1dd   : > { %p1205_p8 = pnand %p1204_p7, %p1198_p2 }
 0x1df   : > { %1208 = shalt.err (!%p1205_p8)
}
 0x1e0   : > { %s1209_s20 = scalar_lea.hbm %s1597_s28, 16  ;;  %s1213_s15 = scalar_lea.hbm %s1704_s10, 32 }
 0x1e1   : > { %p1210_p10 = scmp.ne.s32.totalorder %s1597_s28, %s1209_s20  ;;  %p1214_p12 = scmp.lt.u32.totalorder %s1597_s28, %s1704_s10 }
 0x1e2   : > { %p1215_p13 = scmp.lt.u32.totalorder %s1213_s15, %s1209_s20  ;;  %p1217_p1 = scmp.lt.u32.totalorder %s1209_s20, %s1597_s28 }
 0x1e3   : > { %p1211_p9 = pnand %p1210_p10, %p1408_p5 }
 0x1e4   : > { %p1216_p0 = por %p1215_p13, %p1214_p12 }
 0x1e5   : > { %p1212_p11 = pneg %p1211_p9 }
 0x1e6   : > { %p1218_p2 = por %p1217_p1, %p1216_p0 }
 0x1e8   : > { %p1219_p3 = pnand %p1218_p2, %p1212_p11 }
 0x1ea   : > { %1222 = shalt.err (!%p1219_p3)
}
 0x1eb   : > { %1075 = dma.vmem_to_hbm [thread:$0]  (%p1408_p5), %s1601_s25, 16, %s1597_s28, %s771_s2  }
 0x1ec   : > { %s1735_s5 = scalar_lea.vmem [#allocation8], %s1534_s0  ;;  %s1302_s30 = smov [#allocation8]  }
 0x1ed   : > { %s825_s29 = sshll.u32 %s1735_s5, 4  ;;  %s1227_s20 = sshll.u32 %s1302_s30, 4  ;;  %s826_s29 = int_to_ptr.vmem [resolvable:$true] %s825_s29  ;;  %s1228_s20 = int_to_ptr.vmem [resolvable:$false] %s1227_s20 }
 0x1ee   : > { %s1223_s3 = scalar_lea.vmem %s826_s29, 16  ;;  %s1229_s26 = scalar_lea.vmem %s1228_s20, 32 }
 0x1ef   : > { %p1224_p4 = scmp.ne.s32.totalorder %s826_s29, %s1223_s3  ;;  %p1230_p10 = scmp.lt.s32.totalorder %s826_s29, %s1228_s20 }
 0x1f0   : > { %p1231_p9 = scmp.lt.s32.totalorder %s1229_s26, %s1223_s3 }
 0x1f1   : > { %p1225_p7 = pnand %p1224_p4, %p1408_p5 }
 0x1f2   : > { %p1232_p11 = por %p1231_p9, %p1230_p10 }
 0x1f3   : > { %p1226_p8 = pneg %p1225_p7 }
 0x1f5   : > { %p1233_p12 = pnand %p1232_p11, %p1226_p8 }
 0x1f7   : > { %1236 = shalt.err (!%p1233_p12)
}
 0x1f8   : > { %s1237_s0 = scalar_lea.hbm %s1607_s18, 16  ;;  %s1241_s2 = scalar_lea.hbm %s1706_s12, 32 }
 0x1f9   : > { %p1238_p13 = scmp.ne.s32.totalorder %s1607_s18, %s1237_s0  ;;  %p1242_p2 = scmp.lt.u32.totalorder %s1607_s18, %s1706_s12 }
 0x1fa   : > { %p1243_p3 = scmp.lt.u32.totalorder %s1241_s2, %s1237_s0  ;;  %p1245_p7 = scmp.lt.u32.totalorder %s1237_s0, %s1607_s18 }
 0x1fb   : > { %p1239_p0 = pnand %p1238_p13, %p1408_p5 }
 0x1fc   : > { %p1244_p4 = por %p1243_p3, %p1242_p2 }
 0x1fd   : > { %p1240_p1 = pneg %p1239_p0 }
 0x1fe   : > { %p1246_p8 = por %p1245_p7, %p1244_p4 }
 0x200   : > { %p1247_p10 = pnand %p1246_p8, %p1240_p1 }
 0x202   : > { %1250 = shalt.err (!%p1247_p10)
}
 0x203   : > { %1077 = dma.vmem_to_hbm [thread:$0]  (%p1408_p5), %s826_s29, 16, %s1607_s18, %s1573_s16   ;;  %vm677_vm4 = vcmask 7168  }
 0x204   : > { %s527_s3 = scalar_lea.vmem %s1702_s8, %s1443_s19  ;;  %s515_s20 = scalar_lea.vmem %s1698_s4, %s1443_s19 }
 0x205   : > { %v543_v44 = vld [vmem:[%s515_s20] sm:$0xff]  ;;  %v544_v48 = vld [vmem:[%s515_s20 + $0x8] sm:$0xff]  ;;  %s533_s29 = scalar_lea.vmem %s1703_s9, %s1443_s19 }
 0x206   : > { %v671_v46 = vmul.f32 %v1478_v20, %v543_v44  ;;  %v672_v52 = vmul.f32 %v1478_v20, %v544_v48 }
 0x24a   : > { %v661_v38 = vpop.xlane.xlu0 %660 }
 0x24b   : > { %1148 = vlog2.f32 %v661_v38 }
 0x24e   : > { %v744_v41 = vpop.xlane.xlu0 %743  ;;  %v664_v42 = vpop.xlane.xlu1 %663 }
 0x24f   : > { %748 = vst.msk [vmem:[%s527_s3] sm:$0xff] %vm677_vm4, %v744_v41  ;;  %1150 = vlog2.f32 %v664_v42 }
 0x252   : > { %v747_v43 = vpop.xlane.xlu0 %746 }
 0x253   : > { %749 = vst.msk [vmem:[%s527_s3 + $0x8] sm:$0xff] %vm677_vm4, %v747_v43 }
 0x255   : > { %v1149_v45 = vpop.eup %1148 }
 0x256   : > { %v666_v47 = vmul.f32 0.6931472, %v1149_v45 }
 0x258   : > { %v669_v49 = vadd.f32 %v666_v47, %v1551_v24 }
 0x259   : > { %v1151_v50 = vpop.eup %1150 }
 0x25a   : > { %v673_v51 = vsub.f32 %v669_v49, %v671_v46  ;;  %v668_v53 = vmul.f32 0.6931472, %v1151_v50 }
 0x25c   : > { %v675_v54 = vsel %vm555_vm1, %v673_v51, 0.0  ;;  %v670_v55 = vadd.f32 %v668_v53, %v1554_v27 }
 0x25d   : > { %678 = vst.msk [vmem:[%s533_s29] sm:$0xff] %vm677_vm4, %v675_v54 }
 0x25e   : > { %v674_v56 = vsub.f32 %v670_v55, %v672_v52 }
 0x260   : > { %v676_v57 = vsel %vm556_vm2, %v674_v56, 0.0 }
 0x261   : > { %679 = vst.msk [vmem:[%s533_s29 + $0x8] sm:$0xff] %vm677_vm4, %v676_v57 }
 0x262 PF: > { %p1097_p5 = scmp.ge.s32.totalorder %s1293_s24, 2  ;;  %s853_s19 = sand.u32 1, %s1281_s21  }
 0x263   : > { %s854_s26 = scalar_lea.sflag [#allocation3], %s853_s19 }
 0x264   : > { %p1086_p9 = pnand %p1097_p5, %p1412_p6 }
 0x266   : > { %1272 = dma.done.wait (!%p1086_p9), %s854_s26, 16  }
 0x267   : > { %1274 = vsyncadd (!%p1086_p9), %s854_s26, 4294967280  ;;  %s1736_s0 = sadd.s32 4294967294, %s1293_s24  }
 0x268   : > { %s861_s28 = sand.u32 1, %s1736_s0  }
 0x269   : > { %s862_s25 = scalar_lea.sflag [#allocation7], %s861_s28 }
 0x26a   : > { %1276 = dma.done.wait (!%p1086_p9), %s862_s25, 32  }
 0x26b   : > { %1278 = vsyncadd (!%p1086_p9), %s862_s25, 4294967264  ;;  %s1737_s2 = sld [smem:[#allocation12_spill]]  ;;  %p27_p11 = scmp.ge.s32.totalorder %s1393_s27, 4  }
 0x26c   : > { %s1738_s21 = smov %s1285_s22  ;;  %s1739_s22 = smov %s1289_s23 }
 0x26d   : > { %s1741_s24 = smov %s1393_s27  ;;  %29 = sbr.rel (!%p27_p11) target bundleno = 12 (0xc), region = 157 }
 0x271   : > { %s1740_s23 = smov %s1737_s2 }
 0x274   :  { %874 = vsyncpa [#allocation3], 1 }
 0x275   :  { %876 = vsyncpa [#allocation3 + $0x1], 1 }
 0x276   :  { %877 = vsyncpa [#allocation7], 1 }
 0x277   :  { %879 = vsyncpa [#allocation7 + $0x1], 1 }
 0x278   :  { %880 = vsyncpa [#allocation4], 1 }
 0x279   :  { %882 = vsyncpa [#allocation4 + $0x1], 1 }

</bundles_post_ra>
